<compile_context>
chip_gen: v7x
topology: tpu7x:2x2x1
jax: 0.10.0
libtpu: 0.0.40
codegen_flags: <defaults>
</compile_context>

<pallas_src>
import functools

import jax
import jax.numpy as jnp
from jax.experimental import pallas as pl
from jax.experimental.pallas import tpu as pltpu


def _fused_ac_kernel(x_ref, w1_ref, b1_ref, w2_ref, b2_ref, o_pi_ref, o_vf_ref):
    """relu(relu(x @ W1cat + b1cat) @ W2blk + b2cat), split into the two heads.

    W1cat = [pw1 | vw1]            (F, 128)  -> lane-dense hidden
    W2blk = block-diag(pw2, vw2)   (128, 64)
    Biases are f32; both dots accumulate in f32 on the MXU.
    Output columns of y: [0:latent_pi) policy, [latent_pi:) value.
    """
    x = x_ref[...]
    h = jnp.dot(x, w1_ref[...], preferred_element_type=jnp.float32) + b1_ref[...]
    h = jnp.maximum(h, 0.0)
    y = jnp.dot(h.astype(w2_ref.dtype), w2_ref[...],
                preferred_element_type=jnp.float32) + b2_ref[...]
    y = jnp.maximum(y, 0.0)
    n_pi = o_pi_ref.shape[-1]
    o_pi_ref[...] = y[:, :n_pi].astype(o_pi_ref.dtype)
    o_vf_ref[...] = y[:, n_pi:].astype(o_vf_ref.dtype)


def fused_ac_head(x, w1c, b1c, w2c, b2c, *, o_pi, o_vf, block_b=1024,
                  out_dtype=jnp.float32):
    """Run both heads in one Pallas kernel. Returns (latent_pi, latent_vf)."""
    B, F = x.shape
    H2 = w1c.shape[1]   # 2 * hidden (= 128 for the default config)
    O2 = w2c.shape[1]   # latent_pi + latent_vf (= 64)

    flops = 2 * B * (F * H2 + H2 * O2)
    bytes_accessed = (B * F * x.dtype.itemsize
                      + w1c.size * w1c.dtype.itemsize
                      + w2c.size * w2c.dtype.itemsize
                      + (b1c.size + b2c.size) * 4
                      + B * (o_pi + o_vf) * jnp.dtype(out_dtype).itemsize)
    cost = pl.CostEstimate(flops=flops, transcendentals=0,
                           bytes_accessed=bytes_accessed)

    def out_shapes(rows):
        return (jax.ShapeDtypeStruct((rows, o_pi), out_dtype),
                jax.ShapeDtypeStruct((rows, o_vf), out_dtype))

    if B <= block_b:
        # Small batch: everything (a few hundred KB max) fits trivially in
        # VMEM; single gridless invocation, no pipeline bookkeeping.
        vmem = pl.BlockSpec(memory_space=pltpu.MemorySpace.VMEM)
        return pl.pallas_call(
            _fused_ac_kernel,
            out_shape=out_shapes(B),
            in_specs=[vmem] * 5,
            out_specs=(vmem, vmem),
            cost_estimate=cost,
        )(x, w1c, b1c, w2c, b2c)

    # Large batch: cdiv grid over rows (no whole-array VMEM cliff for
    # non-divisible B); pad the cheap tail so every block is full, slice back
    # after. "parallel" lets v7x's two TensorCores split the row tiles;
    # block_b=1024 keeps >=2 steps/core for B >= 4096 and amortizes the
    # per-step pipeline overhead while staying far under VMEM limits.
    n_blocks = pl.cdiv(B, block_b)
    bp = n_blocks * block_b
    if bp != B:
        x = jnp.pad(x, ((0, bp - B), (0, 0)))

    pi, vf = pl.pallas_call(
        _fused_ac_kernel,
        out_shape=out_shapes(bp),
        grid=(n_blocks,),
        in_specs=[
            pl.BlockSpec((block_b, F), lambda i: (i, 0)),
            # Constant index_maps -> Pallas keeps the tiny (~40 KB bf16)
            # weight/bias blocks resident across all grid steps.
            pl.BlockSpec((F, H2), lambda i: (0, 0)),
            pl.BlockSpec((1, H2), lambda i: (0, 0)),
            pl.BlockSpec((H2, O2), lambda i: (0, 0)),
            pl.BlockSpec((1, O2), lambda i: (0, 0)),
        ],
        out_specs=(
            pl.BlockSpec((block_b, o_pi), lambda i: (i, 0)),
            pl.BlockSpec((block_b, o_vf), lambda i: (i, 0)),
        ),
        compiler_params=pltpu.CompilerParams(
            dimension_semantics=("parallel",)),
        cost_estimate=cost,
    )(x, w1c, b1c, w2c, b2c)

    if bp != B:
        pi, vf = pi[:B], vf[:B]
    return pi, vf


def init_params(key, features_dim, hidden=64, out_dim_pi=32, out_dim_vf=32,
                dtype=jnp.float32):
    """Deterministic parameter init (Kaiming-uniform-ish, like torch default)."""
    ks = jax.random.split(key, 8)

    def lin(kw, kb, fan_in, fan_out):
        bound = 1.0 / jnp.sqrt(fan_in)
        w = jax.random.uniform(kw, (fan_in, fan_out), dtype, -bound, bound)
        b = jax.random.uniform(kb, (1, fan_out), dtype, -bound, bound)
        return w, b

    pw1, pb1 = lin(ks[0], ks[1], features_dim, hidden)
    pw2, pb2 = lin(ks[2], ks[3], hidden, out_dim_pi)
    vw1, vb1 = lin(ks[4], ks[5], features_dim, hidden)
    vw2, vb2 = lin(ks[6], ks[7], hidden, out_dim_vf)
    return dict(policy=(pw1, pb1, pw2, pb2), value=(vw1, vb1, vw2, vb2))


def pack_params(params, compute_dtype=jnp.bfloat16):
    """Pack both heads into one fused parameter set (done once, outside jit).

    Weights -> compute_dtype (bf16 halves weight/x DMA; MXU accumulates f32),
    biases stay f32 (bias + ReLU are done in f32 inside the kernel).
    """
    pw1, pb1, pw2, pb2 = params["policy"]
    vw1, vb1, vw2, vb2 = params["value"]
    _, H = pw1.shape
    o_pi = pw2.shape[1]
    o_vf = vw2.shape[1]

    w1c = jnp.concatenate([pw1, vw1], axis=1).astype(compute_dtype)   # (F, 2H)
    b1c = jnp.concatenate([pb1, vb1], axis=1).astype(jnp.float32)     # (1, 2H)

    w2c = jnp.zeros((2 * H, o_pi + o_vf), dtype=jnp.float32)          # block-diag
    w2c = w2c.at[:H, :o_pi].set(pw2)
    w2c = w2c.at[H:, o_pi:].set(vw2)
    w2c = w2c.astype(compute_dtype)                                   # (2H, 64)
    b2c = jnp.concatenate([pb2, vb2], axis=1).astype(jnp.float32)     # (1, 64)
    return dict(w1c=w1c, b1c=b1c, w2c=w2c, b2c=b2c)


@functools.partial(
    jax.jit, static_argnames=("latent_dim_pi", "latent_dim_vf", "block_b"))
def custom_ac_forward(features, packed, *, latent_dim_pi=32, latent_dim_vf=32,
                      block_b=1024):
    """Equivalent of CustomAC.forward: returns (latent_pi, latent_vf)."""
    x = features.astype(packed["w1c"].dtype)   # bf16 on the MXU path
    return fused_ac_head(x, packed["w1c"], packed["b1c"],
                         packed["w2c"], packed["b2c"],
                         o_pi=latent_dim_pi, o_vf=latent_dim_vf,
                         block_b=block_b)


def _ref_forward(features, params):
    def head(x, w1, b1, w2, b2):
        h = jnp.maximum(x @ w1 + b1, 0.0)
        return jnp.maximum(h @ w2 + b2, 0.0)
    return head(features, *params["policy"]), head(features, *params["value"])


if __name__ == "__main__":
    key = jax.random.PRNGKey(0)
    k_x, k_p, k_xl = jax.random.split(key, 3)

    features_dim = 32          # SB3 features_dim fed into CustomAC
    latent_dim = 32            # latent_dim_pi == latent_dim_vf == 32

    params = init_params(k_p, features_dim, hidden=64,
                         out_dim_pi=latent_dim, out_dim_vf=latent_dim)
    packed = pack_params(params)   # bf16 weights, f32 biases

    # bf16 inputs/weights with f32 accumulation -> relaxed tolerance vs f32 ref.
    TOL = dict(atol=5e-2, rtol=5e-2)

    # --- small batch: gridless whole-array-in-VMEM path ---
    batch = 8
    x = jax.random.normal(k_x, (batch, features_dim), dtype=jnp.float32)
    latent_pi, latent_vf = custom_ac_forward(x, packed)
    jax.block_until_ready((latent_pi, latent_vf))

    ref_pi, ref_vf = _ref_forward(x, params)
    assert latent_pi.shape == (batch, latent_dim)
    assert latent_vf.shape == (batch, latent_dim)
    assert jnp.allclose(latent_pi, ref_pi, **TOL)
    assert jnp.allclose(latent_vf, ref_vf, **TOL)

    # --- larger, NON-divisible batch: tiled "parallel" grid path + padded tail.
    # block_b is lowered here only so the test exercises multiple grid steps at
    # a modest size; the production default is 1024.
    big_batch = 700
    xl = jax.random.normal(k_xl, (big_batch, features_dim), dtype=jnp.float32)
    lpi_l, lvf_l = custom_ac_forward(xl, packed, block_b=256)
    jax.block_until_ready((lpi_l, lvf_l))

    ref_pi_l, ref_vf_l = _ref_forward(xl, params)
    assert lpi_l.shape == (big_batch, latent_dim)
    assert lvf_l.shape == (big_batch, latent_dim)
    assert jnp.allclose(lpi_l, ref_pi_l, **TOL)
    assert jnp.allclose(lvf_l, ref_vf_l, **TOL)

    print("KERNEL_OK")
</pallas_src>

<mosaic_0001>
module attributes {stable_mosaic.version = 11 : i64} {
  func.func @_fused_ac_kernel(%arg0: memref<8x32xbf16, #tpu.memory_space<vmem>>, %arg1: memref<32x128xbf16, #tpu.memory_space<vmem>>, %arg2: memref<1x128xf32, #tpu.memory_space<vmem>>, %arg3: memref<128x64xbf16, #tpu.memory_space<vmem>>, %arg4: memref<1x64xf32, #tpu.memory_space<vmem>>, %arg5: memref<8x32xf32, #tpu.memory_space<vmem>>, %arg6: memref<8x32xf32, #tpu.memory_space<vmem>>) attributes {dimension_semantics = [], scalar_prefetch = 0 : i64, scratch_operands = 0 : i64, tpu.core_type = #tpu.core_type<tc>} {
    %c0 = arith.constant 0 : index
    %c0_0 = arith.constant 0 : index
    %0 = vector.load %arg0[%c0, %c0_0] : memref<8x32xbf16, #tpu.memory_space<vmem>>, vector<8x32xbf16>
    %c0_1 = arith.constant 0 : index
    %c0_2 = arith.constant 0 : index
    %1 = vector.load %arg1[%c0_1, %c0_2] : memref<32x128xbf16, #tpu.memory_space<vmem>>, vector<32x128xbf16>
    %cst = arith.constant dense<0.000000e+00> : vector<8x128xf32>
    %2 = tpu.matmul %0, %1, %cst {dimension_numbers = #tpu.dot_dimension_numbers<[1], [0], [0], [1], [0, 0, 1, 1], [], []>} : vector<8x32xbf16>, vector<32x128xbf16>, vector<8x128xf32> -> vector<8x128xf32>
    %c0_3 = arith.constant 0 : index
    %c0_4 = arith.constant 0 : index
    %3 = vector.load %arg2[%c0_3, %c0_4] : memref<1x128xf32, #tpu.memory_space<vmem>>, vector<1x128xf32>
    %4 = vector.broadcast %3 : vector<1x128xf32> to vector<8x128xf32>
    %5 = arith.addf %2, %4 : vector<8x128xf32>
    %cst_5 = arith.constant 0.000000e+00 : f32
    %6 = vector.broadcast %cst_5 : f32 to vector<8x128xf32>
    %7 = arith.maximumf %5, %6 : vector<8x128xf32>
    %8 = arith.truncf %7 : vector<8x128xf32> to vector<8x128xbf16>
    %c0_6 = arith.constant 0 : index
    %c0_7 = arith.constant 0 : index
    %9 = vector.load %arg3[%c0_6, %c0_7] : memref<128x64xbf16, #tpu.memory_space<vmem>>, vector<128x64xbf16>
    %cst_8 = arith.constant dense<0.000000e+00> : vector<8x64xf32>
    %10 = tpu.matmul %8, %9, %cst_8 {dimension_numbers = #tpu.dot_dimension_numbers<[1], [0], [0], [1], [0, 0, 1, 1], [], []>} : vector<8x128xbf16>, vector<128x64xbf16>, vector<8x64xf32> -> vector<8x64xf32>
    %c0_9 = arith.constant 0 : index
    %c0_10 = arith.constant 0 : index
    %11 = vector.load %arg4[%c0_9, %c0_10] : memref<1x64xf32, #tpu.memory_space<vmem>>, vector<1x64xf32>
    %12 = vector.broadcast %11 : vector<1x64xf32> to vector<8x64xf32>
    %13 = arith.addf %10, %12 : vector<8x64xf32>
    %cst_11 = arith.constant 0.000000e+00 : f32
    %14 = vector.broadcast %cst_11 : f32 to vector<8x64xf32>
    %15 = arith.maximumf %13, %14 : vector<8x64xf32>
    %16 = vector.extract_strided_slice %15 {offsets = [0, 0], sizes = [8, 32], strides = [1, 1]} : vector<8x64xf32> to vector<8x32xf32>
    %c0_12 = arith.constant 0 : index
    %c0_13 = arith.constant 0 : index
    %17 = vector.load %arg5[%c0_12, %c0_13] : memref<8x32xf32, #tpu.memory_space<vmem>>, vector<8x32xf32>
    tpu.vector_store %arg5[%c0_12, %c0_13], %16 {strides = array<i32>} : memref<8x32xf32, #tpu.memory_space<vmem>>, vector<8x32xf32>,
    %18 = vector.extract_strided_slice %15 {offsets = [0, 32], sizes = [8, 32], strides = [1, 1]} : vector<8x64xf32> to vector<8x32xf32>
    %c0_14 = arith.constant 0 : index
    %c0_15 = arith.constant 0 : index
    %19 = vector.load %arg6[%c0_14, %c0_15] : memref<8x32xf32, #tpu.memory_space<vmem>>, vector<8x32xf32>
    tpu.vector_store %arg6[%c0_14, %c0_15], %18 {strides = array<i32>} : memref<8x32xf32, #tpu.memory_space<vmem>>, vector<8x32xf32>,
    return
  }
}

</mosaic_0001>

<bundles_post_ra>
// kernel: custom_ac_forward.1
= control target key start
LH: loop header
LB: loop body
LE: loop exit
PB: predicated region body
PF: predicated region fallthrough
CT: control target
= control target key end

     0   :  { %12 = vsyncpa [#allocation3], 0  ;;  %v357_v1 = vmov 0.0   ;;  %vm358_vm0 = vmmov 0   ;;  %vm49_vm1 = vcmask 261120   ;;  %s463_s0 = inlined_call_operand.vmem [shape: bf16[8,32], index: 0, kind: input, shape index: {}]   ;;  %s464_s1 = inlined_call_operand.vmem [shape: bf16[32,128], index: 1, kind: input, shape index: {}]   ;;  %s465_s2 = inlined_call_operand.vmem [shape: f32[1,128], index: 2, kind: input, shape index: {}]   ;;  %s466_s3 = inlined_call_operand.vmem [shape: bf16[128,64], index: 3, kind: input, shape index: {}]   ;;  %s467_s4 = inlined_call_operand.vmem [shape: f32[1,64], index: 4, kind: input, shape index: {}]   ;;  %s468_s5 = inlined_call_operand.hbm [shape: f32[8,32], index: 5, kind: output, shape index: {0}]   ;;  %s469_s6 = inlined_call_operand.hbm [shape: f32[8,32], index: 6, kind: output, shape index: {1}]  }
   0x1   :  { %v299_v0 = vld [vmem:[%s464_s1] sm:$0xff]   ;;  %266 = vmatprep.subr.bf16.mxu0 %v357_v1  ;;  %274 = vmatprep.subr.bf16.mxu1 %v357_v1  ;;  %v300_v2 = vld [vmem:[%s464_s1 + $0x8] sm:$0xff]   ;;  %v303_v6 = vld [vmem:[%s466_s3 + $0x10] sm:$0xff]  }
   0x2   :  { %267 = vmatpush3.bf16.msra.mxu0 %v299_v0  ;;  %270 = vmatprep.mubr.msk.bf16.mxu0 %vm358_vm0, %v357_v1  ;;  %v301_v3 = vld [vmem:[%s466_s3] sm:$0xff]   ;;  %v302_v4 = vld [vmem:[%s466_s3 + $0x8] sm:$0xff]  }
   0x3   :  { %268 = vmatprep.subr.bf16.mxu0 %v357_v1  ;;  %290 = vmatprep.mubr.msk.bf16.mxu1 %vm358_vm0, %v357_v1  ;;  %v25_v5 = vld [vmem:[%s463_s0] sm:$0xf] }
   0x4   :  { %275 = vmatpush3.bf16.msra.mxu1 %v301_v3 }
   0x5   :  { %276 = vmatprep.subr.bf16.mxu1 %v357_v1 }
   0x6   :  { %269 = vmatpush3.bf16.msra.mxu0 %v300_v2 }
   0x8   :  { %277 = vmatpush3.bf16.msra.mxu1 %v302_v4 }
   0x9   :  { %271 = vmatmul.mubr.msk.bf16.vlgmr.msra.gmra.mrb[0].mxu0 %vm49_vm1, %v25_v5  ;;  %278 = vmatprep.subr.bf16.mxu1 %v357_v1 }
   0xa   :  { %13 = vsyncpa [#allocation5], 0  ;;  %v304_v7 = vld [vmem:[%s466_s3 + $0x18] sm:$0xff]   ;;  %v305_v8 = vld [vmem:[%s466_s3 + $0x20] sm:$0xff]   ;;  %s359_s21 = smov [#allocation2]  }
   0xb   :  { %v306_v9 = vld [vmem:[%s466_s3 + $0x28] sm:$0xff]   ;;  %v307_v10 = vld [vmem:[%s466_s3 + $0x30] sm:$0xff]   ;;  %v308_v11 = vld [vmem:[%s466_s3 + $0x38] sm:$0xff]   ;;  %s219_s3 = sshll.u32 %s359_s21, 4  ;;  %s220_s3 = int_to_ptr.vmem [resolvable:$true] %s219_s3 }
   0xc   :  { %279 = vmatpush3.bf16.msra.mxu1 %v303_v6  ;;  %v241_v12 = vld [vmem:[%s465_s2] ss:$0 sm:$0xff]  ;;  %s360_s2 = smov 96   ;;  %s309_s22 = scalar_lea.vmem %s220_s3, 128 }
   0xd   :  { %280 = vmatprep.subr.bf16.mxu1 %v357_v1  ;;  %v245_v20 = vld [vmem:[%s467_s4] ss:$0 sm:$0xff]  ;;  %p310_p0 = scmp.ne.s32.totalorder %s220_s3, %s309_s22  ;;  %p314_p1 = scmp.lt.s32.totalorder %s220_s3, %s220_s3 }
   0xe   :  { %p315_p2 = scmp.lt.s32.totalorder %s309_s22, %s309_s22 }
  0x10   :  { %281 = vmatpush3.bf16.msra.mxu1 %v304_v7  ;;  %p316_p3 = por %p315_p2, %p314_p1 }
  0x11   :  { %282 = vmatprep.subr.bf16.mxu1 %v357_v1 }
  0x12   :  { %p317_p4 = pnand %p316_p3, %p310_p0 }
  0x14   :  { %283 = vmatpush3.bf16.msra.mxu1 %v305_v8 }
  0x15   :  { %284 = vmatprep.subr.bf16.mxu1 %v357_v1 }
  0x18   :  { %285 = vmatpush3.bf16.msra.mxu1 %v306_v9 }
  0x19   :  { %286 = vmatprep.subr.bf16.mxu1 %v357_v1 }
  0x1c   :  { %287 = vmatpush3.bf16.msra.mxu1 %v307_v10 }
  0x1d   :  { %288 = vmatprep.subr.bf16.mxu1 %v357_v1 }
  0x20   :  { %289 = vmatpush3.bf16.msra.mxu1 %v308_v11 }
  0xdc   :  { %v87_v13 = vpop.f32.mrb[0].mxu0 }
  0xdd   :  { %v88_v14 = vadd.f32 %v241_v12, %v87_v13  ;;  %v272_v15 = vpop.f32.mrb[1].mxu0 }
  0xde   :  { %v90_v16 = vpop.f32.mrb[2].mxu0 }
  0xdf   :  { %v93_v17 = vmax.f32 %v88_v14, 0.0  ;;  %v273_v18 = vpop.f32.mrb[3].mxu0 }
  0xe1   :  { %v94_v19 = vpack.c.bf16 %v93_v17, %v93_v17 }
  0xe3   :  { %291 = vmatmul.mubr.bf16.vlgmr.msra.gmra.mrb[0].mxu1 %v94_v19 }
 0x1b6   :  { %v200_v21 = vpop.f32.mrb[0].mxu1 }
 0x1b7   :  { %v201_v22 = vadd.f32 %v245_v20, %v200_v21  ;;  %v292_v23 = vpop.f32.mrb[1].mxu1 }
 0x1b8   :  { %v203_v24 = vpop.f32.mrb[2].mxu1 }
 0x1b9   :  { %v206_v25 = vmax.f32 %v201_v22, 0.0  ;;  %v293_v26 = vpop.f32.mrb[3].mxu1 }
 0x1bb   :  { %207 = vst.msk [vmem:[#allocation2] sm:$0xff] %vm49_vm1, %v206_v25  ;;  %209 = vrot.lane.b32.xlu0 %v206_v25, %s360_s2 }
 0x1bc   :  { %320 = shalt.err (!%p317_p4)
}
 0x1bd   :  { %s321_s24 = scalar_lea.hbm %s468_s5, 128 }
 0x1be   :  { %p322_p5 = scmp.ne.s32.totalorder %s468_s5, %s321_s24  ;;  %p325_p6 = scmp.lt.u32.totalorder %s321_s24, %s468_s5 }
 0x1c0   :  { %p327_p7 = pnand %p325_p6, %p322_p5 }
 0x1c2   :  { %330 = shalt.err (!%p327_p7)
}
 0x1c3   :  { %222 = dma.vmem_to_hbm [thread:$0]  %s220_s3, 128, %s468_s5, [#allocation3]  }
 0x1c4   :  { %s361_s1 = smov [#allocation4]  }
 0x1c5   :  { %s229_s7 = sshll.u32 %s361_s1, 4  ;;  %s230_s7 = int_to_ptr.vmem [resolvable:$true] %s229_s7 }
 0x1c6   :  { %s331_s8 = scalar_lea.vmem %s230_s7, 128  ;;  %p336_p9 = scmp.lt.s32.totalorder %s230_s7, %s230_s7 }
 0x1c7   :  { %p332_p8 = scmp.ne.s32.totalorder %s230_s7, %s331_s8  ;;  %p337_p10 = scmp.lt.s32.totalorder %s331_s8, %s331_s8 }
 0x1c9   :  { %p338_p11 = por %p337_p10, %p336_p9 }
 0x1cb   :  { %p339_p12 = pnand %p338_p11, %p332_p8 }
 0x22d   :  { %v210_v27 = vpop.permute.xlu0 %209 }
 0x22e   :  { %212 = vst.msk [vmem:[#allocation4] sm:$0xff] %vm49_vm1, %v210_v27 }
 0x22f   :  { %342 = shalt.err (!%p339_p12)
}
 0x230   :  { %s343_s10 = scalar_lea.hbm %s469_s6, 128 }
 0x231   :  { %p344_p13 = scmp.ne.s32.totalorder %s469_s6, %s343_s10  ;;  %p347_p0 = scmp.lt.u32.totalorder %s343_s10, %s469_s6 }
 0x233   :  { %p349_p1 = pnand %p347_p0, %p344_p13 }
 0x235   :  { %352 = shalt.err (!%p349_p1)
}
 0x236   :  { %232 = dma.vmem_to_hbm [thread:$0]  %s230_s7, 128, %s469_s6, [#allocation5]  }
 0x237   :  { %353 = dma.done.wait [#allocation3], 128  }
 0x238   :  { %354 = vsyncadd [#allocation3], 4294967168 }
 0x239   :  { %355 = dma.done.wait [#allocation5], 128  }
 0x23a   :  { %356 = vsyncadd [#allocation5], 4294967168 }
 0x23b   :  { %239 = vsyncpa [#allocation3], 1 }
 0x23c   :  { %240 = vsyncpa [#allocation5], 1 }

</bundles_post_ra>
